<compile_context>
chip_gen: v6e
topology: v6e:2x2x1
jax: 0.10.0
libtpu: 0.0.40
codegen_flags: <defaults>
</compile_context>

<pallas_src>
import functools
import numpy as np
import jax
import jax.numpy as jnp
from jax.experimental import pallas as pl
from jax.experimental.pallas import tpu as pltpu

# dtype of the windowed-DFT MXU operands (weight stored in this dtype, frame rows
# cast in-kernel; accumulation is always f32).  bf16 hits the native MXU path on
# v6e/v7x; use jnp.float32 for exact parity with the f32 PyTorch reference.
MXU_DTYPE = jnp.bfloat16


# ----------------------- deterministic parameter construction -----------------------

def _round_up(x: int, m: int) -> int:
    return ((x + m - 1) // m) * m


def _hamming_window(win_length: int) -> np.ndarray:
    # torch.hamming_window(win_length), periodic=True default
    n = np.arange(win_length, dtype=np.float64)
    return 0.54 - 0.46 * np.cos(2.0 * np.pi * n / win_length)


def _windowed_dft_matrices(n_fft: int, win_length: int, n_keep: int):
    """Real/imag rFFT matrices (first n_keep bins) with the centered window folded in."""
    win = np.zeros(n_fft, dtype=np.float64)
    left = (n_fft - win_length) // 2
    win[left:left + win_length] = _hamming_window(win_length)
    n = np.arange(n_fft, dtype=np.float64)[:, None]
    k = np.arange(n_keep, dtype=np.float64)[None, :]
    ang = 2.0 * np.pi * n * k / n_fft
    cos_m = (win[:, None] * np.cos(ang)).astype(np.float32)   # (n_fft, n_keep)
    sin_m = (win[:, None] * np.sin(ang)).astype(np.float32)   # sign irrelevant for power
    return cos_m, sin_m


def _mel_filterbank(sr: int, n_fft: int, n_mels: int) -> np.ndarray:
    """torchaudio melscale_fbanks: htk scale, norm=None, f_min=0, f_max=sr/2."""
    n_freq = n_fft // 2 + 1
    all_freqs = np.linspace(0.0, sr / 2.0, n_freq)

    def hz_to_mel(f):
        return 2595.0 * np.log10(1.0 + f / 700.0)

    def mel_to_hz(m):
        return 700.0 * (10.0 ** (m / 2595.0) - 1.0)

    m_pts = np.linspace(hz_to_mel(0.0), hz_to_mel(sr / 2.0), n_mels + 2)
    f_pts = mel_to_hz(m_pts)
    f_diff = f_pts[1:] - f_pts[:-1]
    slopes = f_pts[None, :] - all_freqs[:, None]          # (n_freq, n_mels + 2)
    down = -slopes[:, :-2] / f_diff[:-1]
    up = slopes[:, 2:] / f_diff[1:]
    fb = np.maximum(0.0, np.minimum(down, up))            # (n_freq, n_mels)
    return fb.astype(np.float32)


def _build_weights(sr, n_fft, win_length, hop_length, n_mels):
    """Hop-chunked fused [cos|sin] DFT weight (bf16) and lane-padded mel fbank (f32)."""
    n_freq = n_fft // 2 + 1
    fb = _mel_filterbank(sr, n_fft, n_mels)
    # Nyquist-bin drop: with f_max = sr/2 the last filterbank row is exactly zero,
    # so the Nyquist rFFT bin never contributes -> dropping it is lossless and
    # halves the DFT matmul (129 -> 128 kept bins, one 128-lane tile per half).
    if np.allclose(fb[-1], 0.0, atol=1e-6):
        n_keep = n_freq - 1
    else:                                   # guard for exotic configs
        n_keep = n_freq
    nf_eff = _round_up(n_keep, 128)
    nm_pad = _round_up(max(n_mels, 128), 128)

    cos_m, sin_m = _windowed_dft_matrices(n_fft, win_length, n_keep)

    # Chop the (n_fft, 2*nf_eff) weight into hop-length row chunks so that the
    # kernel can compute  spec = sum_j rows[j : j+TILE_T, :] @ W_chunk[j]
    # without ever materializing overlapping frames (frame i, chunk j = wav row i+j).
    n_chunks = -(-n_fft // hop_length)
    dft = np.zeros((n_chunks, hop_length, 2 * nf_eff), np.float32)
    for j in range(n_chunks):
        lo = j * hop_length
        hi = min(lo + hop_length, n_fft)
        dft[j, :hi - lo, :n_keep] = cos_m[lo:hi]
        dft[j, :hi - lo, nf_eff:nf_eff + n_keep] = sin_m[lo:hi]

    mel = np.zeros((nf_eff, nm_pad), np.float32)
    mel[:n_keep, :n_mels] = fb[:n_keep]
    return (jnp.asarray(dft, dtype=MXU_DTYPE), jnp.asarray(mel),
            nf_eff, nm_pad, n_chunks)


# --------------------------------- Pallas kernel ------------------------------------

def _logmel_kernel(rows_ref, halo_ref, dft_ref, mel_ref, out_ref, stats_ref, *,
                   nf_eff, n_mels, n_frames, tile_t, n_chunks, apply_log):
    # rows_ref : (1, TILE_T, hop)   f32 wav rows (frame i's j-th hop-chunk = row i+j)
    # halo_ref : (1, HALO, hop)     f32 wav rows following the tile (overlap halo)
    # dft_ref  : (n_chunks, hop, 2*nf_eff)  hop-chunked [cos|sin] windowed DFT (MXU dtype)
    # mel_ref  : (nf_eff, nm_pad)   zero-padded mel filterbank (f32)
    # out_ref  : (1, TILE_T, nm_pad)
    # stats_ref: (1, 1, 2, nm_pad)  masked lane-partial sum / sum-of-squares
    full = jnp.concatenate([rows_ref[0], halo_ref[0]], axis=0)   # (TILE_T+HALO, hop)
    w_dtype = dft_ref.dtype

    spec = jnp.zeros((tile_t, 2 * nf_eff), jnp.float32)
    for j in range(n_chunks):           # static unroll (n_chunks is tiny, e.g. 4)
        lhs = full[j:j + tile_t, :].astype(w_dtype)
        spec = spec + jnp.dot(lhs, dft_ref[j], preferred_element_type=jnp.float32)

    re = spec[:, :nf_eff]                                        # lane-tile aligned split
    im = spec[:, nf_eff:]
    power = re * re + im * im                                    # |STFT|^2 (pad cols = 0)
    mel = jnp.dot(power, mel_ref[...], preferred_element_type=jnp.float32)
    if apply_log:
        mel = jnp.log(mel + 1e-10)
    out_ref[0] = mel.astype(out_ref.dtype)

    # Masked lane-partial statistics for InstanceNorm2d: exclude padded frame rows
    # (>= n_frames) and padded mel columns (>= n_mels).  Cross-lane finish happens
    # once in the wrapper (keeps the per-tile epilogue off the XLU).
    t = pl.program_id(1)
    row = jax.lax.broadcasted_iota(jnp.int32, mel.shape, 0) + t * tile_t
    col = jax.lax.broadcasted_iota(jnp.int32, mel.shape, 1)
    masked = jnp.where((row < n_frames) & (col < n_mels), mel, 0.0)
    s = jnp.sum(masked, axis=0, keepdims=True)                   # (1, nm_pad)
    ss = jnp.sum(masked * masked, axis=0, keepdims=True)         # (1, nm_pad)
    stats_ref[0, 0] = jnp.concatenate([s, ss], axis=0)


def mel_filterbank_forward(x, dft_w, mel_w, *, n_fft, hop_length, nf_eff, n_mels,
                           n_chunks, apply_log=True, do_norm=True, tile_t=512):
    """x: (B, T, 1) float32 waveform -> (B, n_frames, n_mels) float32."""
    B, T, C = x.shape
    assert C == 1, "MelFilterbank expects a single waveform channel"
    wav = x[..., 0].astype(jnp.float32)
    pad = n_fft // 2
    wav = jnp.pad(wav, ((0, 0), (pad, pad)), mode="reflect")     # center=True, reflect
    n_frames = 1 + T // hop_length

    # Frame tile (multiple of 8); halo = extra rows needed by the last frame of a tile.
    halo = _round_up(max(n_chunks - 1, 1), 8)
    TILE_T = min(tile_t, _round_up(n_frames, 8))
    TILE_T = _round_up(TILE_T, halo)
    assert TILE_T % halo == 0
    nT = pl.cdiv(n_frames, TILE_T)
    n_frames_pad = nT * TILE_T

    # In-kernel framing: reshape the (reflect + zero)-padded wav into hop-length rows.
    # Frame i = rows i .. i+n_chunks-1, assembled implicitly by the chunked DFT matmul.
    n_rows = max(n_frames_pad + halo, pl.cdiv(T + 2 * pad, hop_length))
    wav = jnp.pad(wav, ((0, 0), (0, n_rows * hop_length - wav.shape[1])))
    rows = wav.reshape(B, n_rows, hop_length)

    nm_pad = mel_w.shape[1]
    kernel = functools.partial(
        _logmel_kernel, nf_eff=nf_eff, n_mels=n_mels, n_frames=n_frames,
        tile_t=TILE_T, n_chunks=n_chunks, apply_log=apply_log)

    steps = B * nT
    flops = steps * (2 * TILE_T * n_chunks * hop_length * 2 * nf_eff
                     + 2 * TILE_T * nf_eff * nm_pad
                     + 4 * TILE_T * nf_eff)
    bytes_accessed = (rows.size * 4 + B * nT * halo * hop_length * 4
                      + dft_w.size * dft_w.dtype.itemsize + mel_w.size * 4
                      + B * n_frames_pad * nm_pad * 4 + B * nT * 2 * nm_pad * 4)
    cost = pl.CostEstimate(flops=int(flops),
                           transcendentals=int(steps * TILE_T * nm_pad),
                           bytes_accessed=int(bytes_accessed))

    logmel, stats = pl.pallas_call(
        kernel,
        out_shape=(
            jax.ShapeDtypeStruct((B, n_frames_pad, nm_pad), jnp.float32),
            jax.ShapeDtypeStruct((B, nT, 2, nm_pad), jnp.float32),
        ),
        grid_spec=pltpu.PrefetchScalarGridSpec(
            num_scalar_prefetch=0,
            grid=(B, nT),
            in_specs=[
                # main row tile
                pl.BlockSpec((1, TILE_T, hop_length), lambda b, t: (b, t, 0)),
                # halo rows right after the tile (same array, second view)
                pl.BlockSpec((1, halo, hop_length),
                             lambda b, t: (b, (t + 1) * (TILE_T // halo), 0)),
                # grid-invariant weights (constant index maps -> resident)
                pl.BlockSpec(tuple(dft_w.shape), lambda b, t: (0, 0, 0)),
                pl.BlockSpec(tuple(mel_w.shape), lambda b, t: (0, 0)),
            ],
            out_specs=[
                pl.BlockSpec((1, TILE_T, nm_pad), lambda b, t: (b, t, 0)),
                pl.BlockSpec((1, 1, 2, nm_pad), lambda b, t: (b, t, 0, 0)),
            ],
        ),
        compiler_params=pltpu.CompilerParams(
            dimension_semantics=("parallel", "parallel"),
            vmem_limit_bytes=32 * 1024 * 1024,
        ),
        cost_estimate=cost,
    )(rows, rows, dft_w, mel_w)

    # Final slice back to the true (n_frames, n_mels) region; fuse the cheap
    # InstanceNorm2d finalize (per-batch affine) into the same elementwise pass.
    y = logmel[:, :n_frames, :n_mels]
    if do_norm:
        count = float(n_frames * n_mels)
        total = jnp.sum(stats[:, :, 0, :], axis=(1, 2))
        total_sq = jnp.sum(stats[:, :, 1, :], axis=(1, 2))
        mean = total / count
        var = jnp.maximum(total_sq / count - mean * mean, 0.0)    # biased variance
        rstd = jax.lax.rsqrt(var + 1e-5)                          # InstanceNorm2d eps
        y = (y - mean[:, None, None]) * rstd[:, None, None]
    return y


# ---------------------------------- Featurizer --------------------------------------

class Featurizer:
    """JAX/Pallas port of the PyTorch Featurizer (single-featurizer configs)."""

    def __init__(self, cfg):
        self.cfg = cfg
        self.sr = cfg.sampling_rate
        self.n_fft = cfg.n_fft
        self.n_mels = cfg.n_mels
        self.win_length = int(self.sr * cfg.win_length)
        self.hop_length = int(self.sr * cfg.hop_length)
        self.chop_size = cfg.chop_size
        self.name = cfg.featurizer
        # TODO(synk): 'mfcc'/'log-mfcc' (DCT head) and comma-separated multi-featurizer
        # concatenation are not implemented in this synthetic port.
        if self.name in ("mfsc", "log-mfsc"):
            (self.dft_w, self.mel_w, self.nf_eff, self.nm_pad,
             self.n_chunks) = _build_weights(self.sr, self.n_fft, self.win_length,
                                             self.hop_length, self.n_mels)
        elif self.name not in ("waveform", "wavechops"):
            raise NotImplementedError(self.name)

    def __call__(self, x):
        if self.name in ("mfsc", "log-mfsc"):
            return mel_filterbank_forward(
                x, self.dft_w, self.mel_w,
                n_fft=self.n_fft, hop_length=self.hop_length,
                nf_eff=self.nf_eff, n_mels=self.n_mels, n_chunks=self.n_chunks,
                apply_log=(self.name == "log-mfsc"),
                do_norm=(self.cfg.featurizer_post_norm == "instancenorm2d"),
            )
        if self.name == "waveform":
            return x
        if self.name == "wavechops":                      # pure reshape (glue)
            b, t, c = x.shape
            return x.reshape(b, t // self.chop_size, self.chop_size)
        raise NotImplementedError(self.name)


# ------------------------------------- main ------------------------------------------

class Cfg:
    sampling_rate = 16000
    n_fft = 256
    n_mels = 40
    n_mfcc = 20
    deltas = 0
    win_length = 0.0125      # -> 200 samples
    hop_length = 0.005       # -> 80 samples
    chop_size = 160
    featurizer = "log-mfsc"
    featurizer_post_norm = "instancenorm2d"


if __name__ == "__main__":
    cfg = Cfg()
    feat = Featurizer(cfg)

    key = jax.random.PRNGKey(0)
    B, T, C = 2, 640, 1                                   # (B, T, C) waveform input
    x = jax.random.normal(key, (B, T, C), dtype=jnp.float32)

    y = feat(x)
    y = jax.block_until_ready(y)

    expected_frames = 1 + T // feat.hop_length            # 9
    assert y.shape == (B, expected_frames, cfg.n_mels), y.shape
    assert y.dtype == jnp.float32
    assert bool(jnp.all(jnp.isfinite(y)))
    # per-instance normalization sanity: mean ~ 0
    assert float(jnp.max(jnp.abs(jnp.mean(y, axis=(1, 2))))) < 1e-3

    print("KERNEL_OK")
</pallas_src>

<mosaic_0001>
module attributes {stable_mosaic.version = 11 : i64} {
  func.func @_logmel_kernel(%arg0: i32, %arg1: i32, %arg2: memref<1x16x80xf32, #tpu.memory_space<vmem>>, %arg3: memref<1x8x80xf32, #tpu.memory_space<vmem>>, %arg4: memref<4x80x256xbf16, #tpu.memory_space<vmem>>, %arg5: memref<128x128xf32, #tpu.memory_space<vmem>>, %arg6: memref<1x16x128xf32, #tpu.memory_space<vmem>>, %arg7: memref<1x1x2x128xf32, #tpu.memory_space<vmem>>) attributes {dimension_semantics = [#tpu.dimension_semantics<parallel>, #tpu.dimension_semantics<parallel>], iteration_bounds = array<i64: 2, 1>, scalar_prefetch = 0 : i64, scratch_operands = 0 : i64, tpu.core_type = #tpu.core_type<tc>, window_params = [{transform_indices = @transform_0, window_bounds = array<i64: 1, 16, 80>}, {transform_indices = @transform_1, window_bounds = array<i64: 1, 8, 80>}, {pipeline_mode = #tpu.pipeline_mode<synchronous>, transform_indices = @transform_2, window_bounds = array<i64: 4, 80, 256>}, {pipeline_mode = #tpu.pipeline_mode<synchronous>, transform_indices = @transform_3, window_bounds = array<i64: 128, 128>}, {transform_indices = @transform_4, window_bounds = array<i64: 1, 16, 128>}, {transform_indices = @transform_5, window_bounds = array<i64: 1, 1, 2, 128>}]} {
    %c0 = arith.constant 0 : index
    %c0_0 = arith.constant 0 : index
    %c0_1 = arith.constant 0 : index
    %0 = vector.load %arg2[%c0, %c0_0, %c0_1] : memref<1x16x80xf32, #tpu.memory_space<vmem>>, vector<1x16x80xf32>
    %1 = vector.shape_cast %0 : vector<1x16x80xf32> to vector<16x80xf32>
    %c0_2 = arith.constant 0 : index
    %c0_3 = arith.constant 0 : index
    %c0_4 = arith.constant 0 : index
    %2 = vector.load %arg3[%c0_2, %c0_3, %c0_4] : memref<1x8x80xf32, #tpu.memory_space<vmem>>, vector<1x8x80xf32>
    %3 = vector.shape_cast %2 : vector<1x8x80xf32> to vector<8x80xf32>
    %4 = tpu.concatenate %1, %3 in 0 : vector<16x80xf32>, vector<8x80xf32> -> vector<24x80xf32>
    %cst = arith.constant 0.000000e+00 : f32
    %5 = vector.broadcast %cst : f32 to vector<16x256xf32>
    %6 = vector.extract_strided_slice %4 {offsets = [0, 0], sizes = [16, 80], strides = [1, 1]} : vector<24x80xf32> to vector<16x80xf32>
    %7 = arith.truncf %6 : vector<16x80xf32> to vector<16x80xbf16>
    %c0_5 = arith.constant 0 : index
    %c0_6 = arith.constant 0 : index
    %c0_7 = arith.constant 0 : index
    %8 = vector.load %arg4[%c0_5, %c0_6, %c0_7] : memref<4x80x256xbf16, #tpu.memory_space<vmem>>, vector<1x80x256xbf16>
    %9 = vector.shape_cast %8 : vector<1x80x256xbf16> to vector<80x256xbf16>
    %cst_8 = arith.constant dense<0.000000e+00> : vector<16x256xf32>
    %10 = tpu.matmul %7, %9, %cst_8 {dimension_numbers = #tpu.dot_dimension_numbers<[1], [0], [0], [1], [0, 0, 1, 1], [], []>} : vector<16x80xbf16>, vector<80x256xbf16>, vector<16x256xf32> -> vector<16x256xf32>
    %11 = arith.addf %5, %10 : vector<16x256xf32>
    %12 = vector.extract_strided_slice %4 {offsets = [1, 0], sizes = [16, 80], strides = [1, 1]} : vector<24x80xf32> to vector<16x80xf32>
    %13 = arith.truncf %12 : vector<16x80xf32> to vector<16x80xbf16>
    %c1 = arith.constant 1 : index
    %c0_9 = arith.constant 0 : index
    %c0_10 = arith.constant 0 : index
    %14 = vector.load %arg4[%c1, %c0_9, %c0_10] : memref<4x80x256xbf16, #tpu.memory_space<vmem>>, vector<1x80x256xbf16>
    %15 = vector.shape_cast %14 : vector<1x80x256xbf16> to vector<80x256xbf16>
    %cst_11 = arith.constant dense<0.000000e+00> : vector<16x256xf32>
    %16 = tpu.matmul %13, %15, %cst_11 {dimension_numbers = #tpu.dot_dimension_numbers<[1], [0], [0], [1], [0, 0, 1, 1], [], []>} : vector<16x80xbf16>, vector<80x256xbf16>, vector<16x256xf32> -> vector<16x256xf32>
    %17 = arith.addf %11, %16 : vector<16x256xf32>
    %18 = vector.extract_strided_slice %4 {offsets = [2, 0], sizes = [16, 80], strides = [1, 1]} : vector<24x80xf32> to vector<16x80xf32>
    %19 = arith.truncf %18 : vector<16x80xf32> to vector<16x80xbf16>
    %c2 = arith.constant 2 : index
    %c0_12 = arith.constant 0 : index
    %c0_13 = arith.constant 0 : index
    %20 = vector.load %arg4[%c2, %c0_12, %c0_13] : memref<4x80x256xbf16, #tpu.memory_space<vmem>>, vector<1x80x256xbf16>
    %21 = vector.shape_cast %20 : vector<1x80x256xbf16> to vector<80x256xbf16>
    %cst_14 = arith.constant dense<0.000000e+00> : vector<16x256xf32>
    %22 = tpu.matmul %19, %21, %cst_14 {dimension_numbers = #tpu.dot_dimension_numbers<[1], [0], [0], [1], [0, 0, 1, 1], [], []>} : vector<16x80xbf16>, vector<80x256xbf16>, vector<16x256xf32> -> vector<16x256xf32>
    %23 = arith.addf %17, %22 : vector<16x256xf32>
    %24 = vector.extract_strided_slice %4 {offsets = [3, 0], sizes = [16, 80], strides = [1, 1]} : vector<24x80xf32> to vector<16x80xf32>
    %25 = arith.truncf %24 : vector<16x80xf32> to vector<16x80xbf16>
    %c3 = arith.constant 3 : index
    %c0_15 = arith.constant 0 : index
    %c0_16 = arith.constant 0 : index
    %26 = vector.load %arg4[%c3, %c0_15, %c0_16] : memref<4x80x256xbf16, #tpu.memory_space<vmem>>, vector<1x80x256xbf16>
    %27 = vector.shape_cast %26 : vector<1x80x256xbf16> to vector<80x256xbf16>
    %cst_17 = arith.constant dense<0.000000e+00> : vector<16x256xf32>
    %28 = tpu.matmul %25, %27, %cst_17 {dimension_numbers = #tpu.dot_dimension_numbers<[1], [0], [0], [1], [0, 0, 1, 1], [], []>} : vector<16x80xbf16>, vector<80x256xbf16>, vector<16x256xf32> -> vector<16x256xf32>
    %29 = arith.addf %23, %28 : vector<16x256xf32>
    %30 = vector.extract_strided_slice %29 {offsets = [0, 0], sizes = [16, 128], strides = [1, 1]} : vector<16x256xf32> to vector<16x128xf32>
    %31 = vector.extract_strided_slice %29 {offsets = [0, 128], sizes = [16, 128], strides = [1, 1]} : vector<16x256xf32> to vector<16x128xf32>
    %32 = arith.mulf %30, %30 : vector<16x128xf32>
    %33 = arith.mulf %31, %31 : vector<16x128xf32>
    %34 = arith.addf %32, %33 : vector<16x128xf32>
    %c0_18 = arith.constant 0 : index
    %c0_19 = arith.constant 0 : index
    %35 = vector.load %arg5[%c0_18, %c0_19] : memref<128x128xf32, #tpu.memory_space<vmem>>, vector<128x128xf32>
    %cst_20 = arith.constant dense<0.000000e+00> : vector<16x128xf32>
    %36 = tpu.matmul %34, %35, %cst_20 {dimension_numbers = #tpu.dot_dimension_numbers<[1], [0], [0], [1], [0, 0, 1, 1], [], []>} : vector<16x128xf32>, vector<128x128xf32>, vector<16x128xf32> -> vector<16x128xf32>
    %cst_21 = arith.constant 1.000000e-10 : f32
    %37 = vector.broadcast %cst_21 : f32 to vector<16x128xf32>
    %38 = arith.addf %36, %37 : vector<16x128xf32>
    %39 = math.log %38 : vector<16x128xf32>
    %c0_22 = arith.constant 0 : index
    %c0_23 = arith.constant 0 : index
    %c0_24 = arith.constant 0 : index
    %40 = vector.load %arg6[%c0_22, %c0_23, %c0_24] : memref<1x16x128xf32, #tpu.memory_space<vmem>>, vector<1x16x128xf32>
    %41 = vector.shape_cast %40 : vector<1x16x128xf32> to vector<16x128xf32>
    %42 = vector.shape_cast %39 : vector<16x128xf32> to vector<1x16x128xf32>
    tpu.vector_store %arg6[%c0_22, %c0_23, %c0_24], %42 {strides = array<i32>} : memref<1x16x128xf32, #tpu.memory_space<vmem>>, vector<1x16x128xf32>,
    %43 = tpu.iota {dimensions = array<i32: 0>} : vector<16x128xi32>
    %c16_i32 = arith.constant 16 : i32
    %44 = arith.muli %arg1, %c16_i32 : i32
    %45 = vector.broadcast %44 : i32 to vector<16x128xi32>
    %46 = arith.addi %43, %45 : vector<16x128xi32>
    %47 = tpu.iota {dimensions = array<i32: 1>} : vector<16x128xi32>
    %c9_i32 = arith.constant 9 : i32
    %48 = vector.broadcast %c9_i32 : i32 to vector<16x128xi32>
    %49 = arith.cmpi slt, %46, %48 : vector<16x128xi32>
    %c40_i32 = arith.constant 40 : i32
    %50 = vector.broadcast %c40_i32 : i32 to vector<16x128xi32>
    %51 = arith.cmpi slt, %47, %50 : vector<16x128xi32>
    %52 = arith.andi %49, %51 : vector<16x128xi1>
    %cst_25 = arith.constant 0.000000e+00 : f32
    %53 = vector.broadcast %cst_25 : f32 to vector<16x128xf32>
    %54 = arith.select %52, %39, %53 : vector<16x128xi1>, vector<16x128xf32>
    %cst_26 = arith.constant dense<0.000000e+00> : vector<128xf32>
    %55 = vector.multi_reduction <add>, %54, %cst_26 [0] : vector<16x128xf32> to vector<128xf32>
    %56 = vector.shape_cast %55 : vector<128xf32> to vector<1x128xf32>
    %57 = arith.mulf %54, %54 : vector<16x128xf32>
    %cst_27 = arith.constant dense<0.000000e+00> : vector<128xf32>
    %58 = vector.multi_reduction <add>, %57, %cst_27 [0] : vector<16x128xf32> to vector<128xf32>
    %59 = vector.shape_cast %58 : vector<128xf32> to vector<1x128xf32>
    %60 = tpu.concatenate %56, %59 in 0 : vector<1x128xf32>, vector<1x128xf32> -> vector<2x128xf32>
    %c0_28 = arith.constant 0 : index
    %c0_29 = arith.constant 0 : index
    %c0_30 = arith.constant 0 : index
    %c0_31 = arith.constant 0 : index
    %61 = vector.load %arg7[%c0_28, %c0_29, %c0_30, %c0_31] : memref<1x1x2x128xf32, #tpu.memory_space<vmem>>, vector<1x1x2x128xf32>
    %62 = vector.shape_cast %61 : vector<1x1x2x128xf32> to vector<2x128xf32>
    %63 = vector.shape_cast %60 : vector<2x128xf32> to vector<1x1x2x128xf32>
    tpu.vector_store %arg7[%c0_28, %c0_29, %c0_30, %c0_31], %63 {strides = array<i32>} : memref<1x1x2x128xf32, #tpu.memory_space<vmem>>, vector<1x1x2x128xf32>,
    return
  }
  func.func @transform_0(%arg0: i32, %arg1: i32) -> (i32, i32, i32) {
    %c0_i32 = arith.constant 0 : i32
    %c0_i32_0 = arith.constant 0 : i32
    return %arg0, %arg1, %c0_i32 : i32, i32, i32
  }
  func.func @transform_1(%arg0: i32, %arg1: i32) -> (i32, i32, i32) {
    %c1_i32 = arith.constant 1 : i32
    %0 = arith.addi %arg1, %c1_i32 : i32
    %c2_i32 = arith.constant 2 : i32
    %1 = arith.muli %0, %c2_i32 : i32
    %c0_i32 = arith.constant 0 : i32
    %c0_i32_0 = arith.constant 0 : i32
    return %arg0, %1, %c0_i32 : i32, i32, i32
  }
  func.func @transform_2(%arg0: i32, %arg1: i32) -> (i32, i32, i32) {
    %c0_i32 = arith.constant 0 : i32
    %c0_i32_0 = arith.constant 0 : i32
    %c0_i32_1 = arith.constant 0 : i32
    %c0_i32_2 = arith.constant 0 : i32
    return %c0_i32, %c0_i32_0, %c0_i32_1 : i32, i32, i32
  }
  func.func @transform_3(%arg0: i32, %arg1: i32) -> (i32, i32) {
    %c0_i32 = arith.constant 0 : i32
    %c0_i32_0 = arith.constant 0 : i32
    %c0_i32_1 = arith.constant 0 : i32
    return %c0_i32, %c0_i32_0 : i32, i32
  }
  func.func @transform_4(%arg0: i32, %arg1: i32) -> (i32, i32, i32) {
    %c0_i32 = arith.constant 0 : i32
    %c0_i32_0 = arith.constant 0 : i32
    return %arg0, %arg1, %c0_i32 : i32, i32, i32
  }
  func.func @transform_5(%arg0: i32, %arg1: i32) -> (i32, i32, i32, i32) {
    %c0_i32 = arith.constant 0 : i32
    %c0_i32_0 = arith.constant 0 : i32
    %c0_i32_1 = arith.constant 0 : i32
    return %arg0, %arg1, %c0_i32, %c0_i32_0 : i32, i32, i32, i32
  }
}

</mosaic_0001>

<bundles_post_ra>
// kernel: tpu_custom_call.1
= control target key start
LH: loop header
LB: loop body
LE: loop exit
PB: predicated region body
PF: predicated region fallthrough
CT: control target
= control target key end

     0   :  { %s2011_s0 = inlined_call_operand.hbm [shape: f32[2,24,80], index: 0, kind: input, shape index: {}]   ;;  %s2012_s1 = inlined_call_operand.hbm [shape: f32[2,24,80], index: 1, kind: input, shape index: {}]   ;;  %s2013_s2 = inlined_call_operand.hbm [shape: bf16[4,80,256], index: 2, kind: input, shape index: {}]   ;;  %s2014_s3 = inlined_call_operand.hbm [shape: f32[128,128], index: 3, kind: input, shape index: {}]   ;;  %s2015_s4 = inlined_call_operand.hbm [shape: f32[2,16,128], index: 4, kind: output, shape index: {0}]   ;;  %s2016_s5 = inlined_call_operand.hbm [shape: f32[2,1,2,128], index: 5, kind: output, shape index: {1}]  }
   0x1   :  { %2024 = sst [smem:[#allocation24_spill]] %s2011_s0 }
   0x2   :  { %2025 = sst [smem:[#allocation25_spill]] %s2013_s2 }
   0x3   :  { %2026 = sst [smem:[#allocation26_spill]] %s2014_s3 }
   0x4   :  { %11 = vsyncpa [#allocation3], 0 }
   0x5   :  { %13 = vsyncpa [#allocation3 + $0x1], 0 }
   0x6   :  { %14 = vsyncpa [#allocation6], 0 }
   0x7   :  { %16 = vsyncpa [#allocation6 + $0x1], 0 }
   0x8   :  { %17 = vsyncpa [#allocation9], 0 }
   0x9   :  { %18 = vsyncpa [#allocation4], 0 }
   0xa   :  { %20 = vsyncpa [#allocation4 + $0x1], 0 }
   0xb   :  { %21 = vsyncpa [#allocation12], 0 }
   0xc   :  { %23 = vsyncpa [#allocation12 + $0x1], 0  ;;  %s1732_s18 = smov 0   ;;  %s1734_s19 = smov 0  }
   0xd   :  { %s1736_s20 = smov 0   ;;  %s1738_s21 = smov 0  }
   0xe   :  { %s1740_s22 = smov 0   ;;  %s1742_s23 = smov 0  }
   0xf LB: > { %2027 = sst [smem:[#allocation19_spill]] %s1677_s20  ;;  %s1763_s24 = sadd.s32 4294967295, %s1689_s23   ;;  %s1689_s23 = sphi %s1742_s23, %s29_s23   ;;  %s1685_s22 = sphi %s1740_s22, %s2048_s22   ;;  %s1681_s21 = sphi %s1738_s21, %s2047_s21   ;;  %s1677_s20 = sphi %s1736_s20, %s2046_s20   ;;  %s1673_s19 = sphi %s1734_s19, %s2050_s19   ;;  %s1669_s18 = sphi %s1732_s18, %s2049_s18  }
  0x10   : > { %2028 = sst [smem:[#allocation20_spill]] %s1685_s22  ;;  %s1174_s25 = sadd.s32 4294967294, %s1689_s23  }
  0x11   : > { %2029 = sst [smem:[#allocation21_spill]] %s1689_s23  ;;  %p63_p0 = scmp.ne.s32.totalorder %s1673_s19, %s1669_s18 }
  0x12   : > { %p64_p1 = scmp.eq.s32.totalorder %s1763_s24, 0  ;;  %p163_p2 = scmp.eq.s32.totalorder %s1763_s24, 1 }
  0x13   : > { %p169_p3 = scmp.eq.s32.totalorder %s1174_s25, 1  ;;  %p1175_p5 = scmp.ge.s32.totalorder %s1689_s23, 1 }
  0x14   : > { %p1772_p4 = por %p64_p1, %p63_p0  ;;  %p204_p7 = scmp.lt.s32.totalorder %s1689_s23, 3 }
  0x15   : > { %p1777_p6 = por %p169_p3, %p63_p0  ;;  %s1691_s29 = smov [#allocation7]  }
  0x16   : > { %p1782_p8 = pnand %p1175_p5, %p204_p7  ;;  %s216_s30 = sshll.u32 %s1691_s29, 4  ;;  %s217_s30 = int_to_ptr.vmem [resolvable:$true] %s216_s30 }
  0x17   : > { %s1692_s7 = smov [#allocation8]   ;;  %s1469_s9 = scalar_lea.vmem %s217_s30, 5120 }
  0x18   : > { %p1312_p9 = pneg %p1782_p8  ;;  %s229_s8 = sshll.u32 %s1692_s7, 4  ;;  %s230_s8 = int_to_ptr.vmem [resolvable:$true] %s229_s8 }
  0x19   : > { %p1470_p13 = scmp.ne.s32.totalorder %s217_s30, %s1469_s9  ;;  %p1477_p5 = scmp.lt.s32.totalorder %s217_s30, %s217_s30 }
  0x1a   : > { %p1791_p11 = pnand %p1312_p9, %p64_p1  ;;  %p1478_p7 = scmp.lt.s32.totalorder %s1469_s9, %s1469_s9 }
  0x1c   : > { %p1460_p12 = pneg %p1791_p11  ;;  %p1479_p10 = por %p1478_p7, %p1477_p5 }
  0x1e   : > { %p1472_p0 = pnand %p1470_p13, %p1460_p12 }
  0x20   : > { %p1473_p3 = pneg %p1472_p0 }
  0x22   : > { %p1480_p9 = pnand %p1479_p10, %p1473_p3 }
  0x24   : > { %1483 = shalt.err (!%p1480_p9)
}
  0x25   : > { %s2017_s10 = smov 128   ;;  %s2018_s11 = smov 8  }
  0x26   : > { %s2034_s2 = sld [smem:[#allocation25_spill]]  ;;  %s1495_s14 = scalar_lea.vmem %s230_s8, 2048 }
  0x27   : > { %p1496_p13 = scmp.ne.s32.totalorder %s230_s8, %s1495_s14  ;;  %p1503_p10 = scmp.lt.s32.totalorder %s230_s8, %s230_s8 }
  0x28   : > { %p1504_p3 = scmp.lt.s32.totalorder %s1495_s14, %s1495_s14 }
  0x29   : > { %p1498_p0 = pnand %p1496_p13, %p1460_p12 }
  0x2a   : > { %p1505_p7 = por %p1504_p3, %p1503_p10 }
  0x2b   : > { %p1499_p5 = pneg %p1498_p0 }
  0x2c   : > { %1315 = dma.hbm_to_vmem [thread:$0]  (!%p1791_p11), %s2034_s2, 5120, %s217_s30, [#allocation6], %s2017_s10, %s2017_s10, %s2018_s11  }
  0x2d   : > { %p1506_p9 = pnand %p1505_p7, %p1499_p5 }
  0x2f   : > { %1509 = shalt.err (!%p1506_p9)
}
  0x30   : > { %s2035_s3 = sld [smem:[#allocation26_spill]]  ;;  %s41_s17 = sadd.s32 1, %s1685_s22 }
  0x31   : > { %s50_s25 = sadd.s32 1, %s1677_s20  ;;  %p43_p12 = scmp.ge.s32.totalorder %s41_s17, 2 }
  0x32   : > { %p57_p13 = scmp.ne.s32.totalorder %s1677_s20, %s1673_s19  ;;  %p58_p0 = scmp.eq.s32.totalorder %s1689_s23, 0 }
  0x33   : > { %p1335_p5 = scmp.lt.s32.totalorder %s1689_s23, 2  ;;  %s2052_s17 = smov (%p43_p12, %s41_s17), 0 }
  0x34   : > { %2036 = sst [smem:[#allocation22_spill]] %s2052_s17  ;;  %p59_p10 = por %p58_p0, %p57_p13 }
  0x35   : > { %p1829_p3 = por %p163_p2, %p57_p13  ;;  %s45_s30 = ssub.s32 %s1685_s22, %s2052_s17 }
  0x36   : > { %1318 = dma.hbm_to_vmem [thread:$0]  (!%p1791_p11), %s2035_s3, 2048, %s230_s8, [#allocation9], %s2017_s10, %s2017_s10, %s2018_s11  }
  0x37   : > { %s1836_s6 = sand.u32 1, %s1677_s20   ;;  %p48_p11 = scmp.eq.s32.totalorder %s45_s30, 0 }
  0x38   : > { %s1179_s7 = sshll.u32 %s1836_s6, 4  ;;  %s1295_s8 = smul.u32 384, %s1685_s22 }
  0x39   : > { %s1841_s9 = scalar_select %p48_p11, %s1677_s20, %s50_s25  }
  0x3a   : > { %s2039_s0 = sld [smem:[#allocation24_spill]]  ;;  %s247_s15 = scalar_lea.vmem [#allocation2], %s1179_s7 }
  0x3b   : > { %2038 = sst [smem:[#allocation23_spill]] %s1841_s9  ;;  %s262_s16 = sshll.u32 %s247_s15, 4  ;;  %s263_s16 = int_to_ptr.vmem [resolvable:$true] %s262_s16 }
  0x3c   : > { %p1848_p2 = pnand %p1335_p5, %p59_p10  ;;  %s272_s11 = sand.u32 1, %s1689_s23  }
  0x3d   : > { %s244_s30 = scalar_lea.sflag [#allocation3], %s1836_s6  ;;  %s1523_s25 = scalar_lea.vmem %s263_s16, 256 }
  0x3e   : > { %p1512_p7 = pneg %p1848_p2  ;;  %p1524_p9 = scmp.ne.s32.totalorder %s263_s16, %s1523_s25 }
  0x3f   : > { %s1695_s7 = smov [#allocation2]  }
  0x40   : > { %s260_s14 = scalar_lea.hbm %s2039_s0, %s1295_s8  ;;  %p1526_p12 = pnand %p1524_p9, %p1512_p7 }
  0x41   : > { %s1528_s12 = sshll.u32 %s1695_s7, 4  ;;  %s1529_s12 = int_to_ptr.vmem [resolvable:$false] %s1528_s12 }
  0x42   : > { %p1527_p13 = pneg %p1526_p12  ;;  %s1530_s13 = scalar_lea.vmem %s1529_s12, 512 }
  0x43   : > { %p1531_p0 = scmp.lt.s32.totalorder %s263_s16, %s1529_s12  ;;  %p1532_p5 = scmp.lt.s32.totalorder %s1530_s13, %s1523_s25 }
  0x45   : > { %p1533_p10 = por %p1532_p5, %p1531_p0 }
  0x47   : > { %p1534_p11 = pnand %p1533_p10, %p1527_p13 }
  0x49   : > { %1537 = shalt.err (!%p1534_p11)
}
  0x4a   : > { %s2041_s15 = smov 8   ;;  %s2042_s0 = smov 128  }
  0x4b   : > { %1322 = dma.hbm_to_vmem [thread:$0]  (!%p1848_p2), %s260_s14, 256, %s263_s16, %s244_s30, %s2042_s0, %s2042_s0, %s2041_s15  }
  0x4c   : > { %s1181_s2 = sshll.u32 %s1836_s6, 3  ;;  %s1065_s7 = scalar_lea.hbm %s2012_s1, %s1295_s8 }
  0x4d   : > { %s1066_s22 = scalar_lea.hbm %s1065_s7, 256  ;;  %s276_s9 = scalar_lea.vmem [#allocation5], %s1181_s2 }
  0x4e   : > { %s287_s12 = sshll.u32 %s276_s9, 4  ;;  %s273_s25 = scalar_lea.sflag [#allocation6], %s272_s11  ;;  %s288_s12 = int_to_ptr.vmem [resolvable:$true] %s287_s12 }
  0x4f   : > { %s1551_s13 = scalar_lea.vmem %s288_s12, 128  ;;  %s1696_s20 = smov [#allocation5]  }
  0x50   : > { %p1552_p9 = scmp.ne.s32.totalorder %s288_s12, %s1551_s13  ;;  %s1556_s23 = sshll.u32 %s1696_s20, 4  ;;  %s1557_s23 = int_to_ptr.vmem [resolvable:$false] %s1556_s23 }
  0x51   : > { %s1558_s0 = scalar_lea.vmem %s1557_s23, 256  ;;  %p1559_p0 = scmp.lt.s32.totalorder %s288_s12, %s1557_s23 }
  0x52   : > { %p1554_p12 = pnand %p1552_p9, %p1512_p7  ;;  %p1560_p5 = scmp.lt.s32.totalorder %s1558_s0, %s1551_s13 }
  0x54   : > { %p1555_p13 = pneg %p1554_p12  ;;  %p1561_p10 = por %p1560_p5, %p1559_p0 }
  0x56   : > { %p1562_p11 = pnand %p1561_p10, %p1555_p13 }
  0x58   : > { %1565 = shalt.err (!%p1562_p11)
}
  0x59   : > { %1325 = dma.hbm_to_vmem [thread:$0]  (!%p1848_p2), %s1066_s22, 128, %s288_s12, %s273_s25  }
  0x5a   : > { %296 = sbr.rel (%p1782_p8) target bundleno = 624 (0x270), region = 36  ;;  %s1876_s2 = sand.u32 (!%p1782_p8), 1, %s1673_s19  }
  0x5b   : > { %s1184_s3 = sshll.u32 (!%p1782_p8), %s1876_s2, 4  ;;  %s299_s20 = scalar_lea.sflag (!%p1782_p8), [#allocation3], %s1876_s2 }
  0x5c   : > { %s302_s23 = scalar_lea.vmem (!%p1782_p8), [#allocation2], %s1184_s3 }
  0x5f   : > { %1644 = dma.done.wait (%p1772_p4), %s299_s20, 256  }
  0x60   : > { %1646 = vsyncadd (%p1772_p4), %s299_s20, 4294967040  ;;  %s307_s22 = sand.u32 1, %s1763_s24   ;;  %s1185_s28 = sshll.u32 %s1876_s2, 3 }
  0x61   : > { %s308_s10 = scalar_lea.sflag [#allocation6], %s307_s22  ;;  %s311_s11 = scalar_lea.vmem [#allocation5], %s1185_s28 }
  0x62   : > { %1648 = dma.done.wait (%p1772_p4), %s308_s10, 128  }
  0x63   : > { %1650 = vsyncadd (%p1772_p4), %s308_s10, 4294967168 }
  0x64   : > { %1652 = dma.done.wait (%p64_p1), [#allocation6], 5120  }
  0x65   : > { %1654 = vsyncadd (%p64_p1), [#allocation6], 4294962176 }
  0x66   : > { %1656 = dma.done.wait (%p64_p1), [#allocation9], 2048  }
  0x67   : > { %1658 = vsyncadd (%p64_p1), [#allocation9], 4294965248  ;;  %v1697_v0 = vmov 0   ;;  %v1394_v1 = vld [vmem:[#allocation7 + $0x94] ss:$8 sps:$4 sm:$0xff]   ;;  %vm454_vm1 = vcmask 654336  }
  0x68   : > { %490 = vmatprep.mubr.bf16.mxu1 %v1697_v0  ;;  %698 = vmatprep.mubr.bf16.mxu0 %v1697_v0  ;;  %v1396_v2 = vld [vmem:[#allocation7 + $0x90] ss:$8 sps:$4 sm:$0xff]   ;;  %v1397_v3 = vld [vmem:[#allocation7 + $0x84] ss:$8 sps:$4 sm:$0xff]   ;;  %v1399_v4 = vld [vmem:[#allocation7 + $0x80] ss:$8 sps:$4 sm:$0xff]  }
  0x69   : > { %464 = vmatprep.subr.bf16.mxu1 %v1394_v1  ;;  %v1400_v5 = vld [vmem:[#allocation7 + $0x74] ss:$8 sps:$4 sm:$0xff]   ;;  %v1402_v6 = vld [vmem:[#allocation7 + $0x70] ss:$8 sps:$4 sm:$0xff]   ;;  %v1403_v10 = vld [vmem:[#allocation7 + $0x64] ss:$8 sps:$4 sm:$0xff]  }
  0x6a   : > { %465 = vmatpush1.bf16.msra.mxu1 %v1396_v2  ;;  %v365_v7 = vld [vmem:[%s302_s23] sm:$0xff]  ;;  %v366_v8 = vld [vmem:[%s302_s23 + $0x8] sm:$0xff]  ;;  %vm391_vm0 = vsmask.f32 7424  ;;  %vm609_vm2 = vcmask 1046528   ;;  %s348_s24 = scalar_lea.vmem [#allocation10], %s1184_s3 }
  0x6b   : > { %466 = vmatprep.subr.bf16.mxu1 %v1397_v3  ;;  %v367_v9 = vld [vmem:[%s311_s11] sm:$0xff]  ;;  %v1902_v11 = vpack.c.bf16 %v366_v8, %v365_v7  ;;  %v1412_v13 = vld [vmem:[#allocation7 + $0xe4] ss:$8 sps:$4 sm:$0xff]   ;;  %v1414_v15 = vld [vmem:[#allocation7 + $0xe0] ss:$8 sps:$4 sm:$0xff]   ;;  %s993_s26 = sshll.u32 %s348_s24, 4  ;;  %s1934_s26 = int_to_ptr.vmem [resolvable:$true] %s993_s26 }
  0x6c   : > { %v1904_v12 = vpack.c.bf16 %v367_v9, %v367_v9  ;;  %v1405_v16 = vld [vmem:[#allocation7 + $0x60] ss:$8 sps:$4 sm:$0xff]   ;;  %672 = vmatprep.subr.bf16.mxu0 %v1412_v13  ;;  %v1406_v19 = vld [vmem:[#allocation7 + $0x54] ss:$8 sps:$4 sm:$0xff]   ;;  %v1420_v22 = vld [vmem:[#allocation7 + $0xd0] ss:$8 sps:$4 sm:$0xff]  }
  0x6d   : > { %v395_v14 = vshll.u32 %v1902_v11, 16  ;;  %v393_v17 = vshrl.u32 %v1902_v11, 16  ;;  %673 = vmatpush1.bf16.msra.mxu0 %v1414_v15  ;;  %v1418_v21 = vld [vmem:[#allocation7 + $0xd4] ss:$8 sps:$4 sm:$0xff]   ;;  %v1408_v23 = vld [vmem:[#allocation7 + $0x50] ss:$8 sps:$4 sm:$0xff]  }
  0x6e   : > { %467 = vmatpush1.bf16.msra.mxu1 %v1399_v4  ;;  %v400_v18 = vshll.u32 %v1904_v12, 16  ;;  %v1411_v24 = vld [vmem:[#allocation7 + $0x44] ss:$8 sps:$4 sm:$0xff]   ;;  %674 = vmatprep.subr.bf16.mxu0 %v1418_v21  ;;  %v1426_v28 = vld [vmem:[#allocation7 + $0xc0] ss:$8 sps:$4 sm:$0xff]   ;;  %v610_v38 = vrot.slane %v1902_v11, 1 }
  0x6f   : > { %468 = vmatprep.subr.bf16.mxu1 %v1400_v5  ;;  %v397_v20 = vrot.slane %v395_v14, 1  ;;  %v1424_v27 = vld [vmem:[#allocation7 + $0xc4] ss:$8 sps:$4 sm:$0xff]   ;;  %v1409_v29 = vld [vmem:[#allocation7 + $0x40] ss:$8 sps:$4 sm:$0xff]   ;;  %v611_v39 = vrot.slane %v1904_v12, 1 }
  0x70   : > { %v402_v26 = vrot.slane %v400_v18, 1  ;;  %v1430_v30 = vld [vmem:[#allocation7 + $0xb4] ss:$8 sps:$4 sm:$0xff]   ;;  %v1432_v33 = vld [vmem:[#allocation7 + $0xb0] ss:$8 sps:$4 sm:$0xff]   ;;  %v728_v52 = vshrl.u32 %v1904_v12, 16 }
  0x71   : > { %v398_v25 = vor.u32 %v397_v20, %v393_v17  ;;  %675 = vmatpush1.bf16.msra.mxu0 %v1420_v22  ;;  %v1417_v32 = vld [vmem:[#allocation7 + $0x34] ss:$8 sps:$4 sm:$0xff]   ;;  %v1436_v34 = vld [vmem:[#allocation7 + $0xa4] ss:$8 sps:$4 sm:$0xff]   ;;  %v1415_v35 = vld [vmem:[#allocation7 + $0x30] ss:$8 sps:$4 sm:$0xff]   ;;  %v612_v42 = vsel %vm609_vm2, %v610_v38, %v611_v39 }
  0x72   : > { %469 = vmatpush1.bf16.msra.mxu1 %v1402_v6  ;;  %676 = vmatprep.subr.bf16.mxu0 %v1424_v27  ;;  %v1423_v36 = vld [vmem:[#allocation7 + $0x24] ss:$8 sps:$4 sm:$0xff]   ;;  %v1438_v37 = vld [vmem:[#allocation7 + $0xa0] ss:$8 sps:$4 sm:$0xff]   ;;  %v1429_v41 = vld [vmem:[#allocation7 + $0x14] ss:$8 sps:$4 sm:$0xff]  }
  0x73   : > { %470 = vmatprep.subr.bf16.mxu1 %v1403_v10  ;;  %v403_v31 = vsel %vm391_vm0, %v398_v25, %v402_v26  ;;  %v1421_v40 = vld [vmem:[#allocation7 + $0x20] ss:$8 sps:$4 sm:$0xff]   ;;  %v1427_v43 = vld [vmem:[#allocation7 + $0x10] ss:$8 sps:$4 sm:$0xff]   ;;  %v1435_v44 = vld [vmem:[#allocation7 + $0x4] ss:$8 sps:$4 sm:$0xff]  }
  0x74   : > { %v1433_v45 = vld [vmem:[#allocation7] ss:$8 sps:$4 sm:$0xff]   ;;  %v1441_v46 = vld [vmem:[#allocation7 + $0x134] ss:$8 sps:$4 sm:$0xff]   ;;  %v1439_v47 = vld [vmem:[#allocation7 + $0x130] ss:$8 sps:$4 sm:$0xff]  }
  0x75   : > { %677 = vmatpush1.bf16.msra.mxu0 %v1426_v28  ;;  %v1444_v48 = vld [vmem:[#allocation7 + $0x124] ss:$8 sps:$4 sm:$0xff]   ;;  %v1442_v49 = vld [vmem:[#allocation7 + $0x120] ss:$8 sps:$4 sm:$0xff]   ;;  %v1447_v50 = vld [vmem:[#allocation7 + $0x114] ss:$8 sps:$4 sm:$0xff]  }
  0x76   : > { %471 = vmatpush1.bf16.msra.mxu1 %v1405_v16  ;;  %678 = vmatprep.subr.bf16.mxu0 %v1430_v30  ;;  %v1445_v51 = vld [vmem:[#allocation7 + $0x110] ss:$8 sps:$4 sm:$0xff]   ;;  %v1450_v53 = vld [vmem:[#allocation7 + $0x104] ss:$8 sps:$4 sm:$0xff]   ;;  %v725_v54 = vrot.slane %v393_v17, 1  ;;  %v731_v55 = vrot.slane %v400_v18, 2 }
  0x77   : > { %472 = vmatprep.subr.bf16.mxu1 %v1406_v19  ;;  %v1448_v56 = vld [vmem:[#allocation7 + $0x100] ss:$8 sps:$4 sm:$0xff]   ;;  %v726_v57 = vrot.slane %v395_v14, 2  ;;  %v730_v58 = vrot.slane %v728_v52, 1  ;;  %v1453_v59 = vld [vmem:[#allocation7 + $0xf4] ss:$8 sps:$4 sm:$0xff]   ;;  %v937_v52 = vlaneseq }
  0x78   : > { %v1451_v60 = vld [vmem:[#allocation7 + $0xf0] ss:$8 sps:$4 sm:$0xff]   ;;  %vm724_vm3 = vsmask.f32 6400  ;;  %v853_v2 = vld [vmem:[#allocation8 + $0x68] sm:$0xff]  ;;  %v852_v3 = vld [vmem:[#allocation8 + $0x60] sm:$0xff] }
  0x79   : > { %679 = vmatpush1.bf16.msra.mxu0 %v1432_v33  ;;  %v727_v61 = vor.u32 %v726_v57, %v725_v54  ;;  %v732_v62 = vor.u32 %v731_v55, %v730_v58  ;;  %v854_v1 = vld [vmem:[#allocation8 + $0x70] sm:$0xff]  ;;  %v851_v4 = vld [vmem:[#allocation8 + $0x58] sm:$0xff]  ;;  %v849_v6 = vld [vmem:[#allocation8 + $0x48] sm:$0xff]  ;;  %v938_v55 = vshrl.u32 %v937_v52, 7  ;;  %v945_v57 = vand.u32 127, %v937_v52  ;;  %s1241_s17 = sshll.u32 %s1681_s21, 8 }
  0x7a   : > { %473 = vmatpush1.bf16.msra.mxu1 %v1408_v23  ;;  %680 = vmatprep.subr.bf16.mxu0 %v1436_v34  ;;  %v850_v5 = vld [vmem:[#allocation8 + $0x50] sm:$0xff]  ;;  %v848_v7 = vld [vmem:[#allocation8 + $0x40] sm:$0xff]  ;;  %v847_v8 = vld [vmem:[#allocation8 + $0x38] sm:$0xff]  ;;  %s1939_s9 = scalar_lea.hbm %s2015_s4, %s1241_s17  ;;  %s973_s14 = scalar_lea.sflag [#allocation4], %s1876_s2 }
  0x7b   : > { %559 = vmatprep.subr.bf16.mxu1 %v1411_v24  ;;  %v733_v63 = vsel %vm724_vm3, %v727_v61, %v732_v62  ;;  %v846_v9 = vld [vmem:[#allocation8 + $0x30] sm:$0xff]  ;;  %v845_v10 = vld [vmem:[#allocation8 + $0x28] sm:$0xff]  ;;  %v843_v12 = vld [vmem:[#allocation8 + $0x18] sm:$0xff]  ;;  %vm948_vm5 = vcmp.lt.s32.totalorder %v945_v57, 40  ;;  %s1567_s16 = scalar_lea.vmem %s1934_s26, 256  ;;  %s1698_s30 = smov [#allocation10]  }
  0x7c   : > { %v842_v13 = vld [vmem:[#allocation8 + $0x10] sm:$0xff]  ;;  %v841_v14 = vld [vmem:[#allocation8 + $0x8] sm:$0xff]  ;;  %v840_v15 = vld [vmem:[#allocation8] sm:$0xff]  ;;  %p1568_p1 = scmp.ne.s32.totalorder %s1934_s26, %s1567_s16  ;;  %s1571_s15 = sshll.u32 %s1698_s30, 4  ;;  %s1572_s15 = int_to_ptr.vmem [resolvable:$false] %s1571_s15 }
  0x7d   : > { %1200 = vmatmul.mubr.msk.bf16.vlgmr.msra.gmra.mxu1 %vm454_vm1, %v403_v31  ;;  %681 = vmatpush1.bf16.msra.mxu0 %v1438_v37  ;;  %s1573_s7 = scalar_lea.vmem %s1572_s15, 512  ;;  %p1574_p2 = scmp.lt.s32.totalorder %s1934_s26, %s1572_s15 }
  0x7e   : > { %560 = vmatpush1.bf16.msra.mxu1 %v1409_v29  ;;  %585 = vmatprep.mubr.bf16.mxu1 %v1697_v0  ;;  %p1569_p4 = pnand %p1568_p1, %p1829_p3  ;;  %p1575_p7 = scmp.lt.s32.totalorder %s1573_s7, %s1567_s16 }
  0x7f   : > { %561 = vmatprep.subr.bf16.mxu1 %v1417_v32 }
  0x80   : > { %1222 = vmatmul.mubr.msk.bf16.vlgmr.msra.gmra.mxu0 %vm454_vm1, %v612_v42  ;;  %p1570_p8 = pneg %p1569_p4  ;;  %p1576_p9 = por %p1575_p7, %p1574_p2 }
  0x82   : > { %562 = vmatpush1.bf16.msra.mxu1 %v1415_v35  ;;  %p1577_p12 = pnand %p1576_p9, %p1570_p8 }
  0x83   : > { %563 = vmatprep.subr.bf16.mxu1 %v1423_v36 }
  0x86   : > { %564 = vmatpush1.bf16.msra.mxu1 %v1421_v40 }
  0x87   : > { %565 = vmatprep.subr.bf16.mxu1 %v1429_v41 }
  0x8a   : > { %566 = vmatpush1.bf16.msra.mxu1 %v1427_v43 }
  0x8b   : > { %567 = vmatprep.subr.bf16.mxu1 %v1435_v44 }
  0x8e   : > { %568 = vmatpush1.bf16.msra.mxu1 %v1433_v45 }
  0x8f   : > { %793 = vmatprep.subr.bf16.mxu1 %v1441_v46 }
  0x91   : > { %1211 = vmatmul.mubr.msk.bf16.vlgmr.msra.gmra.mxu1 %vm454_vm1, %v1902_v11  ;;  %v844_v11 = vld [vmem:[#allocation8 + $0x20] sm:$0xff] }
  0x92   : > { %794 = vmatpush1.bf16.msra.mxu1 %v1439_v47  ;;  %819 = vmatprep.mubr.bf16.mxu1 %v1697_v0  ;;  %v855_v0 = vld [vmem:[#allocation8 + $0x78] sm:$0xff] }
  0x93   : > { %795 = vmatprep.subr.bf16.mxu1 %v1444_v48  ;;  %1260 = vmatprep.subr.mxu0 %v855_v0 }
  0x94   : > { %1261 = vmatpush3.msra.mxu0 %v855_v0 }
  0x95   : > { %1262 = vmatprep.subr.mxu0 %v854_v1 }
  0x96   : > { %796 = vmatpush1.bf16.msra.mxu1 %v1442_v49  ;;  %1263 = vmatpush3.msra.mxu0 %v854_v1 }
  0x97   : > { %797 = vmatprep.subr.bf16.mxu1 %v1447_v50  ;;  %1264 = vmatprep.subr.mxu0 %v853_v2 }
  0x98   : > { %1265 = vmatpush3.msra.mxu0 %v853_v2 }
  0x99   : > { %1266 = vmatprep.subr.mxu0 %v852_v3 }
  0x9a   : > { %798 = vmatpush1.bf16.msra.mxu1 %v1445_v51  ;;  %1267 = vmatpush3.msra.mxu0 %v852_v3 }
  0x9b   : > { %799 = vmatprep.subr.bf16.mxu1 %v1450_v53  ;;  %1268 = vmatprep.subr.mxu0 %v851_v4 }
  0x9c   : > { %1269 = vmatpush3.msra.mxu0 %v851_v4 }
  0x9d   : > { %1270 = vmatprep.subr.mxu0 %v850_v5 }
  0x9e   : > { %800 = vmatpush1.bf16.msra.mxu1 %v1448_v56  ;;  %1271 = vmatpush3.msra.mxu0 %v850_v5  ;;  %v939_v56 = vadd.s32 8, %v938_v55 }
  0x9f   : > { %801 = vmatprep.subr.bf16.mxu1 %v1453_v59  ;;  %1272 = vmatprep.subr.mxu0 %v849_v6 }
  0xa0   : > { %1273 = vmatpush3.msra.mxu0 %v849_v6  ;;  %vm947_vm4 = vcmp.lt.s32.totalorder %v939_v56, 9 }
  0xa1   : > { %1274 = vmatprep.subr.mxu0 %v848_v7  ;;  %vm950_vm6 = vmand %vm947_vm4, %vm948_vm5 }
  0xa2   : > { %802 = vmatpush1.bf16.msra.mxu1 %v1451_v60  ;;  %1275 = vmatpush3.msra.mxu0 %v848_v7 }
  0xa3   : > { %1276 = vmatprep.subr.mxu0 %v847_v8 }
  0xa4   : > { %1277 = vmatpush3.msra.mxu0 %v847_v8 }
  0xa5   : > { %1233 = vmatmul.mubr.msk.bf16.vlgmr.msra.gmra.mxu1 %vm454_vm1, %v733_v63  ;;  %1278 = vmatprep.subr.mxu0 %v846_v9 }
  0xa6   : > { %1279 = vmatpush3.msra.mxu0 %v846_v9 }
  0xa7   : > { %1280 = vmatprep.subr.mxu0 %v845_v10 }
  0xa8   : > { %1281 = vmatpush3.msra.mxu0 %v845_v10 }
  0xa9   : > { %1282 = vmatprep.subr.mxu0 %v844_v11 }
  0xaa   : > { %1283 = vmatpush3.msra.mxu0 %v844_v11 }
  0xab   : > { %1284 = vmatprep.subr.mxu0 %v843_v12 }
  0xac   : > { %1285 = vmatpush3.msra.mxu0 %v843_v12 }
  0xad   : > { %1286 = vmatprep.subr.mxu0 %v842_v13 }
  0xae   : > { %1287 = vmatpush3.msra.mxu0 %v842_v13 }
  0xaf   : > { %1288 = vmatprep.subr.mxu0 %v841_v14 }
  0xb0   : > { %1289 = vmatpush3.msra.mxu0 %v841_v14 }
  0xb1   : > { %1290 = vmatprep.subr.mxu0 %v840_v15 }
  0xb2   : > { %1291 = vmatpush3.msra.mxu0 %v840_v15 }
 0x13d   : > { %v492_v16 = vpop.f32.mrf.mxu1 }
 0x13f   : > { %v494_v17 = vpop.f32.mrf.mxu1 }
 0x140   : > { %v700_v22 = vpop.f32.mrf.mxu0 }
 0x141   : > { %v496_v18 = vpop.f32.mrf.mxu1 }
 0x142   : > { %v702_v24 = vpop.f32.mrf.mxu0 }
 0x143   : > { %v498_v19 = vpop.f32.mrf.mxu1 }
 0x144   : > { %v704_v28 = vpop.f32.mrf.mxu0 }
 0x146   : > { %v706_v35 = vpop.f32.mrf.mxu0 }
 0x151   : > { %v587_v20 = vpop.f32.mrf.mxu1 }
 0x152   : > { %v588_v25 = vadd.f32 %v587_v20, %v492_v16 }
 0x153   : > { %v589_v21 = vpop.f32.mrf.mxu1 }
 0x154   : > { %v590_v26 = vadd.f32 %v589_v21, %v494_v17  ;;  %v709_v29 = vadd.f32 %v700_v22, %v588_v25 }
 0x155   : > { %v591_v23 = vpop.f32.mrf.mxu1 }
 0x156   : > { %v592_v30 = vadd.f32 %v591_v23, %v496_v18  ;;  %v710_v32 = vadd.f32 %v702_v24, %v590_v26 }
 0x157   : > { %v593_v27 = vpop.f32.mrf.mxu1 }
 0x158   : > { %v594_v33 = vadd.f32 %v593_v27, %v498_v19  ;;  %v711_v37 = vadd.f32 %v704_v28, %v592_v30 }
 0x15a   : > { %v712_v40 = vadd.f32 %v706_v35, %v594_v33 }
 0x165   : > { %v821_v31 = vpop.f32.mrf.mxu1 }
 0x166   : > { %v830_v34 = vadd.f32 %v821_v31, %v709_v29 }
 0x167   : > { %v823_v36 = vpop.f32.mrf.mxu1 }
 0x168   : > { %v831_v38 = vadd.f32 %v823_v36, %v710_v32  ;;  %v834_v41 = vmul.f32 %v830_v34, %v830_v34 }
 0x169   : > { %v825_v39 = vpop.f32.mrf.mxu1 }
 0x16a   : > { %v836_v42 = vmul.f32 %v831_v38, %v831_v38  ;;  %v832_v43 = vadd.f32 %v825_v39, %v711_v37 }
 0x16b   : > { %v827_v44 = vpop.f32.mrf.mxu1 }
 0x16c   : > { %v838_v45 = vadd.f32 %v836_v42, %v834_v41  ;;  %v833_v46 = vadd.f32 %v827_v44, %v712_v40  ;;  %v835_v47 = vmul.f32 %v832_v43, %v832_v43 }
 0x16e   : > { %v837_v48 = vmul.f32 %v833_v46, %v833_v46  ;;  %1292 = vmatprep.mubr.f32.mxu0 %v838_v45 }
 0x170   : > { %v839_v49 = vadd.f32 %v837_v48, %v835_v47 }
 0x172   : > { %1293 = vmatmul.mubr.f32.vlgmr.msra.gmra.mxu0 %v839_v49 }
 0x232   : > { %v1294_v50 = vpop.f32.mrf.mxu0 }
 0x233   : > { %v928_v51 = vadd.f32 1e-10, %v1294_v50 }
 0x234   : > { %v922_v53 = vpop.f32.mrf.mxu0 }
 0x235   : > { %1454 = vlog2.f32 %v928_v51  ;;  %v923_v54 = vadd.f32 1e-10, %v922_v53 }
 0x237   : > { %1456 = vlog2.f32 %v923_v54 }
 0x242   : > { %v1455_v58 = vpop.eup %1454 }
 0x243   : > { %v934_v59 = vmul.f32 0.6931472, %v1455_v58 }
 0x244   : > { %v1457_v60 = vpop.eup %1456 }
 0x245   : > { %936 = vst [vmem:[%s348_s24 + $0x8] sm:$0xff] %v934_v59  ;;  %v952_v61 = vsel %vm950_vm6, %v934_v59, 0.0  ;;  %v932_v62 = vmul.f32 0.6931472, %v1457_v60 }
 0x246   : > { %v961_v0 = vmul.f32 %v952_v61, %v952_v61 }
 0x247   : > { %935 = vst [vmem:[%s348_s24] sm:$0xff] %v932_v62  ;;  %v951_v63 = vsel %vm948_vm5, %v932_v62, 0.0 }
 0x248   : > { %v953_v1 = vadd.f32 %v952_v61, %v951_v63  ;;  %v960_v2 = vmul.f32 %v951_v63, %v951_v63 }
 0x249   : > { %1580 = shalt.err (!%p1577_p12)
}
 0x24a   : > { %s1581_s12 = scalar_lea.hbm %s1939_s9, 256  ;;  %s1585_s0 = scalar_lea.hbm %s2015_s4, 512 }
 0x24b   : > { %p1582_p13 = scmp.ne.s32.totalorder %s1939_s9, %s1581_s12  ;;  %p1586_p10 = scmp.lt.s32.totalorder %s1939_s9, %s2015_s4 }
 0x24c   : > { %p1587_p11 = scmp.lt.s32.totalorder %s1585_s0, %s1581_s12 }
 0x24d   : > { %p1583_p0 = pnand %p1582_p13, %p1829_p3 }
 0x24e   : > { %p1588_p1 = por %p1587_p11, %p1586_p10 }
 0x24f   : > { %p1584_p5 = pneg %p1583_p0 }
 0x251   : > { %p1589_p4 = pnand %p1588_p1, %p1584_p5 }
 0x253   : > { %1592 = shalt.err (!%p1589_p4)
}
 0x254   : > { %s1699_s23 = smov 128   ;;  %s1700_s22 = smov 8   ;;  %v954_v3 = vrot.slane %v953_v1, 4  ;;  %v962_v4 = vadd.f32 %v961_v0, %v960_v2  ;;  %vm969_vm7 = vcmask 1040384  }
 0x255   : > { %1308 = dma.vmem_to_hbm [thread:$0]  (%p1829_p3), %s1934_s26, 256, %s1939_s9, %s973_s14, %s1699_s23, %s1699_s23, %s1700_s22  }
 0x256   : > { %v955_v5 = vadd.f32 %v954_v3, %v953_v1  ;;  %v963_v6 = vrot.slane %v962_v4, 4  ;;  %s1189_s28 = sshll.u32 %s1876_s2, 1  ;;  %s1238_s10 = sshll.u32 %s1681_s21, 5 }
 0x257   : > { %s355_s11 = scalar_lea.vmem [#allocation11], %s1189_s28  ;;  %s1969_s6 = scalar_lea.hbm %s2016_s5, %s1238_s10 }
 0x258   : > { %v956_v7 = vrot.slane %v955_v5, 2  ;;  %v964_v8 = vadd.f32 %v963_v6, %v962_v4  ;;  %s1010_s24 = sshll.u32 %s355_s11, 4  ;;  %s978_s8 = scalar_lea.sflag [#allocation12], %s1876_s2  ;;  %s1011_s24 = int_to_ptr.vmem [resolvable:$true] %s1010_s24 }
 0x259   : > { %s1593_s9 = scalar_lea.vmem %s1011_s24, 32  ;;  %s1701_s21 = smov [#allocation11]  }
 0x25a   : > { %v957_v9 = vadd.f32 %v956_v7, %v955_v5  ;;  %v965_v10 = vrot.slane %v964_v8, 2  ;;  %p1594_p8 = scmp.ne.s32.totalorder %s1011_s24, %s1593_s9  ;;  %s1597_s14 = sshll.u32 %s1701_s21, 4  ;;  %s1598_s14 = int_to_ptr.vmem [resolvable:$false] %s1597_s14 }
 0x25b   : > { %s1599_s16 = scalar_lea.vmem %s1598_s14, 64  ;;  %p1600_p9 = scmp.lt.s32.totalorder %s1011_s24, %s1598_s14 }
 0x25c   : > { %v958_v11 = vrot.slane %v957_v9, 1  ;;  %v966_v12 = vadd.f32 %v965_v10, %v964_v8  ;;  %p1595_p2 = pnand %p1594_p8, %p1829_p3  ;;  %p1601_p12 = scmp.lt.s32.totalorder %s1599_s16, %s1593_s9 }
 0x25e   : > { %v967_v13 = vrot.slane %v966_v12, 1  ;;  %v959_v14 = vadd.f32 %v958_v11, %v957_v9  ;;  %p1596_p7 = pneg %p1595_p2  ;;  %p1602_p13 = por %p1601_p12, %p1600_p9 }
 0x260   : > { %v968_v15 = vadd.f32 %v967_v13, %v966_v12  ;;  %p1603_p0 = pnand %p1602_p13, %p1596_p7 }
 0x262   : > { %v970_v16 = vsel %vm969_vm7, %v959_v14, %v968_v15 }
 0x263   : > { %971 = vst [vmem:[%s355_s11] sm:$0x3] %v970_v16 }
 0x264   : > { %1606 = shalt.err (!%p1603_p0)
}
 0x265   : > { %s1607_s30 = scalar_lea.hbm %s1969_s6, 32  ;;  %s1611_s7 = scalar_lea.hbm %s2016_s5, 64 }
 0x266   : > { %p1608_p5 = scmp.ne.s32.totalorder %s1969_s6, %s1607_s30  ;;  %p1612_p1 = scmp.lt.s32.totalorder %s1969_s6, %s2016_s5 }
 0x267   : > { %p1613_p4 = scmp.lt.s32.totalorder %s1611_s7, %s1607_s30 }
 0x268   : > { %p1609_p10 = pnand %p1608_p5, %p1829_p3 }
 0x269   : > { %p1614_p8 = por %p1613_p4, %p1612_p1 }
 0x26a   : > { %p1610_p11 = pneg %p1609_p10 }
 0x26c   : > { %p1615_p2 = pnand %p1614_p8, %p1610_p11 }
 0x26e   : > { %1618 = shalt.err (!%p1615_p2)
}
 0x26f   : > { %1309 = dma.vmem_to_hbm [thread:$0]  (%p1829_p3), %s1011_s24, 32, %s1969_s6, %s978_s8  }
 0x270 PF: > { %s2043_s13 = sld [smem:[#allocation21_spill]]  ;;  %s1022_s0 = sand.u32 1, %s1669_s18  }
 0x271   : > { %s1023_s3 = scalar_lea.sflag [#allocation4], %s1022_s0 }
 0x276   : > { %p2044_p7 = scmp.ge.s32.totalorder %s2043_s13, 2 }
 0x278   : > { %p1327_p9 = pnand %p2044_p7, %p1777_p6 }
 0x27a   : > { %p1328_p12 = pneg %p1327_p9 }
 0x27c   : > { %1660 = dma.done.wait (%p1328_p12), %s1023_s3, 256  }
 0x27d   : > { %1662 = vsyncadd (%p1328_p12), %s1023_s3, 4294967040  ;;  %s1032_s20 = scalar_lea.sflag [#allocation12], %s1022_s0 }
 0x27e   : > { %1664 = dma.done.wait (%p1328_p12), %s1032_s20, 32  }
 0x27f   : > { %1666 = vsyncadd (%p1328_p12), %s1032_s20, 4294967264  ;;  %s29_s23 = sadd.s32 1, %s2043_s13   ;;  %s2045_s29 = sld [smem:[#allocation19_spill]] }
 0x280   : > { %p26_p13 = scmp.ge.s32.totalorder %s29_s23, 4   ;;  %s2046_s20 = sld [smem:[#allocation23_spill]] }
 0x281   : > { %s2047_s21 = sld [smem:[#allocation20_spill]]  ;;  %s2049_s18 = smov %s1673_s19 }
 0x282   : > { %s2048_s22 = sld [smem:[#allocation22_spill]]  ;;  %28 = sbr.rel (!%p26_p13) target bundleno = 15 (0xf), region = 122 }
 0x285   : > { %s2050_s19 = smov %s2045_s29 }
 0x287   :  { %1037 = vsyncpa [#allocation3], 1 }
 0x288   :  { %1039 = vsyncpa [#allocation3 + $0x1], 1 }
 0x289   :  { %1040 = vsyncpa [#allocation6], 1 }
 0x28a   :  { %1042 = vsyncpa [#allocation6 + $0x1], 1 }
 0x28b   :  { %1043 = vsyncpa [#allocation9], 1 }
 0x28c   :  { %1044 = vsyncpa [#allocation4], 1 }
 0x28d   :  { %1046 = vsyncpa [#allocation4 + $0x1], 1 }
 0x28e   :  { %1047 = vsyncpa [#allocation12], 1 }
 0x28f   :  { %1049 = vsyncpa [#allocation12 + $0x1], 1 }

</bundles_post_ra>
